<compile_context>
chip_gen: v5e
topology: v5e:2x2
jax: 0.10.0
libtpu: 0.0.40
codegen_flags: <defaults>
</compile_context>

<pallas_src>
import math

import jax
import jax.numpy as jnp
import numpy as np
from jax import lax
from jax.experimental import pallas as pl
from jax.experimental.pallas import tpu as pltpu


# Finite "masked" value: exp(NEG_INF - m) underflows to exactly 0 in f32, no NaNs
# even if a kv block is entirely masked (more robust than -inf).
NEG_INF = -1.0e30

_VMEM_LIMIT_BYTES = 32 * 1024 * 1024  # explicit scoped-VMEM limit (safe on v5e/v6e/v7x)


# ----------------------------------------------------------------------------
# ALiBi slopes (identical to the PyTorch reference implementation)
# ----------------------------------------------------------------------------
def get_alibi_slopes(n_heads):
    def get_slopes_power_of_2(n):
        start = 2 ** (-(2 ** (-(math.log2(n) - 3))))
        ratio = start
        return [start * ratio**i for i in range(n)]

    if n_heads <= 0:
        return []
    if n_heads & (n_heads - 1) == 0:
        return get_slopes_power_of_2(n_heads)
    closest = 2 ** math.floor(math.log2(n_heads))
    slopes = get_slopes_power_of_2(closest)
    if n_heads > closest:
        extra_base = 2 ** (-(2 ** (-(math.log2(2 * closest) - 3))))
        num_remaining = n_heads - closest
        slopes.extend([extra_base * extra_base**i for i in range(num_remaining)])
    return slopes[:n_heads]


def _pick_tile(n, candidates=(512, 256, 128)):
    """Largest preferred tile that divides n; fall back to a single block."""
    for c in candidates:
        if n % c == 0:
            return c
    return n


# ----------------------------------------------------------------------------
# Stage 1: fused QKV projection
# ----------------------------------------------------------------------------
def _make_qkv_kernel(C, scale):
    def kernel(x_ref, w_ref, b_ref, q_ref, k_ref, v_ref):
        # x_ref: (tr, C) compute dtype; w_ref: (C, 3C) compute dtype; b_ref: (1, 3C) f32
        qkv = jnp.dot(x_ref[...], w_ref[...], preferred_element_type=jnp.float32)
        qkv = qkv + b_ref[...]
        # 1/sqrt(head_dim) folded into q here (one (tr, C) multiply) instead of
        # scaling every (tq, tk) score block per head later.
        q_ref[...] = (qkv[:, 0 * C:1 * C] * scale).astype(q_ref.dtype)
        k_ref[...] = qkv[:, 1 * C:2 * C].astype(k_ref.dtype)
        v_ref[...] = qkv[:, 2 * C:3 * C].astype(v_ref.dtype)

    return kernel


# ----------------------------------------------------------------------------
# Stage 2: flash-style causal attention with ALiBi + fused output projection
# ----------------------------------------------------------------------------
def _make_flash_kernel(n_head, head_dim, C, tq, tk, compute_dtype, approx_recip):
    def kernel(slopes_ref, q_ref, k_ref, v_ref, wproj_ref, bproj_ref, o_ref,
               m_ref, l_ref, acc_ref):
        qi = pl.program_id(1)
        ki = pl.program_id(2)
        nk = pl.num_programs(2)

        @pl.when(ki == 0)
        def _init():
            m_ref[...] = jnp.full((n_head, tq, 1), NEG_INF, jnp.float32)
            l_ref[...] = jnp.zeros((n_head, tq, 1), jnp.float32)
            acc_ref[...] = jnp.zeros((n_head, tq, head_dim), jnp.float32)

        # Skip kv blocks that lie entirely in the future of this q tile
        # (fully causally masked): first key index > last query index.
        @pl.when(ki * tk <= qi * tq + (tq - 1))
        def _update():
            # (t, C) -> (n_head, t, head_dim): heads ride the MXU as a batch,
            # no per-head lane slicing and no explicit k transpose.
            qh = jnp.swapaxes(q_ref[0].reshape(tq, n_head, head_dim), 0, 1)
            kh = jnp.swapaxes(k_ref[0].reshape(tk, n_head, head_dim), 0, 1)
            vh = jnp.swapaxes(v_ref[0].reshape(tk, n_head, head_dim), 0, 1)

            s = jnp.einsum("nqd,nkd->nqk", qh, kh,
                           preferred_element_type=jnp.float32)  # (n, tq, tk) f32

            # ALiBi relative positions + causal mask for this (qi, ki) tile.
            i_idx = qi * tq + lax.broadcasted_iota(jnp.int32, (tq, tk), 0)
            j_idx = ki * tk + lax.broadcasted_iota(jnp.int32, (tq, tk), 1)
            causal = (j_idx <= i_idx)[None, :, :]
            rel = (j_idx - i_idx).astype(jnp.float32)[None, :, :]
            s = jnp.where(causal, s + slopes_ref[...] * rel, NEG_INF)

            # Online (flash) softmax update, all statistics in f32.
            m_prev = m_ref[...]
            m_new = jnp.maximum(m_prev, jnp.max(s, axis=-1, keepdims=True))
            alpha = jnp.exp(m_prev - m_new)
            p = jnp.exp(s - m_new)
            l_ref[...] = alpha * l_ref[...] + jnp.sum(p, axis=-1, keepdims=True)
            acc_ref[...] = alpha * acc_ref[...] + jnp.einsum(
                "nqk,nkd->nqd", p.astype(compute_dtype), vh,
                preferred_element_type=jnp.float32)
            m_ref[...] = m_new

        @pl.when(ki == nk - 1)
        def _finalize():
            inv_l = pl.reciprocal(l_ref[...], approx=approx_recip)  # EUP on fast path
            y = acc_ref[...] * inv_l                      # (n, tq, hd) f32
            y = jnp.swapaxes(y, 0, 1).reshape(tq, C)      # (tq, C) head-interleaved
            out = jnp.dot(y.astype(compute_dtype), wproj_ref[...],
                          preferred_element_type=jnp.float32) + bproj_ref[...]
            # TODO(synk): for C < 128 the store is a masked partial vst; a wrapper-side
            # pad of C to 128 would make it lane-dense (real model widths already are).
            o_ref[0] = out.astype(o_ref.dtype)

    return kernel


# ----------------------------------------------------------------------------
# Wrapper
# ----------------------------------------------------------------------------
def symbolic_attention_alibi(x, w_attn, b_attn, w_proj, b_proj, n_head,
                             compute_dtype=jnp.bfloat16):
    """Forward of SymbolicCausalSelfAttentionALiBi (use_proj=False, dropout=0).

    x: (B, T, C); w_attn: (C, 3C); b_attn: (1, 3C); w_proj: (C, C); b_proj: (1, C).
    compute_dtype: dtype of MXU matmul operands (bf16 fast path); accumulation,
    bias adds and softmax statistics stay in f32.
    """
    B, T, C = x.shape
    assert C % n_head == 0
    head_dim = C // n_head
    scale = 1.0 / math.sqrt(head_dim)
    cdt = jnp.dtype(compute_dtype)
    approx_recip = cdt == jnp.dtype(jnp.bfloat16)

    slopes = jnp.asarray(get_alibi_slopes(n_head), jnp.float32).reshape(n_head, 1, 1)

    # Matmul operands in compute dtype; biases stay f32 (added to f32 accumulators).
    x_c = x.astype(cdt)
    w_attn_c = w_attn.astype(cdt)
    w_proj_c = w_proj.astype(cdt)
    b_attn_f = b_attn.astype(jnp.float32)
    b_proj_f = b_proj.astype(jnp.float32)

    # ---------------- stage 1: QKV projection over flattened (B*T) rows ---------
    # TODO(synk): add K/N weight tiling (k grid axis + f32 accumulator) once C is
    # large enough that w_attn/w_proj no longer fit VMEM fully resident.
    R = B * T
    tr = _pick_tile(R)
    x2 = x_c.reshape(R, C)

    q2, k2, v2 = pl.pallas_call(
        _make_qkv_kernel(C, scale),
        out_shape=(jax.ShapeDtypeStruct((R, C), cdt),) * 3,
        grid_spec=pltpu.PrefetchScalarGridSpec(
            num_scalar_prefetch=0,
            grid=(R // tr,),
            in_specs=[
                pl.BlockSpec((tr, C), lambda r: (r, 0)),        # x rows
                pl.BlockSpec((C, 3 * C), lambda r: (0, 0)),     # w_attn (resident)
                pl.BlockSpec((1, 3 * C), lambda r: (0, 0)),     # b_attn
            ],
            out_specs=[pl.BlockSpec((tr, C), lambda r: (r, 0))] * 3,
        ),
        compiler_params=pltpu.CompilerParams(
            dimension_semantics=("parallel",),
            vmem_limit_bytes=_VMEM_LIMIT_BYTES,
        ),
    )(x2, w_attn_c, b_attn_f)

    q = q2.reshape(B, T, C)
    k = k2.reshape(B, T, C)
    v = v2.reshape(B, T, C)

    # ---------------- stage 2: flash attention + fused output projection --------
    tq = _pick_tile(T)
    tk = _pick_tile(T)
    kernel = _make_flash_kernel(n_head, head_dim, C, tq, tk, cdt, approx_recip)

    out = pl.pallas_call(
        kernel,
        out_shape=jax.ShapeDtypeStruct((B, T, C), x.dtype),
        grid_spec=pltpu.PrefetchScalarGridSpec(
            num_scalar_prefetch=0,
            grid=(B, T // tq, T // tk),
            in_specs=[
                pl.BlockSpec((n_head, 1, 1), lambda b, i, j: (0, 0, 0)),  # alibi slopes
                pl.BlockSpec((1, tq, C), lambda b, i, j: (b, i, 0)),      # q
                pl.BlockSpec((1, tk, C), lambda b, i, j: (b, j, 0)),      # k
                pl.BlockSpec((1, tk, C), lambda b, i, j: (b, j, 0)),      # v
                pl.BlockSpec((C, C), lambda b, i, j: (0, 0)),             # w_proj
                pl.BlockSpec((1, C), lambda b, i, j: (0, 0)),             # b_proj
            ],
            out_specs=pl.BlockSpec((1, tq, C), lambda b, i, j: (b, i, 0)),
            scratch_shapes=[
                pltpu.VMEM((n_head, tq, 1), jnp.float32),         # running max m
                pltpu.VMEM((n_head, tq, 1), jnp.float32),         # running sum l
                pltpu.VMEM((n_head, tq, head_dim), jnp.float32),  # output accumulator
            ],
        ),
        compiler_params=pltpu.CompilerParams(
            dimension_semantics=("parallel", "parallel", "arbitrary"),
            vmem_limit_bytes=_VMEM_LIMIT_BYTES,
        ),
    )(slopes, q, k, v, w_proj_c, b_proj_f)

    return out


# ----------------------------------------------------------------------------
# Pure-JAX reference (mirrors the PyTorch forward) for correctness checks
# ----------------------------------------------------------------------------
def reference_forward(x, w_attn, b_attn, w_proj, b_proj, n_head):
    B, T, C = x.shape
    head_dim = C // n_head
    slopes = jnp.asarray(get_alibi_slopes(n_head), dtype=jnp.float32)

    qkv = x @ w_attn + b_attn[0]
    q, k, v = jnp.split(qkv, 3, axis=-1)
    q = q.reshape(B, T, n_head, head_dim).transpose(0, 2, 1, 3)
    k = k.reshape(B, T, n_head, head_dim).transpose(0, 2, 1, 3)
    v = v.reshape(B, T, n_head, head_dim).transpose(0, 2, 1, 3)

    scale = 1.0 / math.sqrt(head_dim)
    att = jnp.einsum("bhtd,bhsd->bhts", q, k) * scale
    if T > 1:
        ctx = jnp.arange(T, dtype=jnp.float32)
        rel = ctx[None, :] - ctx[:, None]
        causal = jnp.tril(jnp.ones((T, T), dtype=bool))
        bias = slopes[:, None, None] * rel[None, :, :]
        bias = jnp.where(causal[None, :, :], bias, -jnp.inf)
        att = att + bias[None, :, :, :]
    att = jax.nn.softmax(att, axis=-1)
    y = jnp.einsum("bhts,bhsd->bhtd", att, v)
    y = y.transpose(0, 2, 1, 3).reshape(B, T, C)
    return y @ w_proj + b_proj[0]


# ----------------------------------------------------------------------------
if __name__ == "__main__":
    # Config: n_embd=32, n_head=4 (head_dim=8), bias=True, dropout=0.0
    B, T, C, n_head = 2, 8, 32, 4

    key = jax.random.PRNGKey(0)
    kx, k1, k2, k3, k4 = jax.random.split(key, 5)

    x = jax.random.normal(kx, (B, T, C), dtype=jnp.float32)
    # Deterministic parameter init (synthetic; not a checkpoint load).
    w_attn = jax.random.normal(k1, (C, 3 * C), dtype=jnp.float32) * 0.02
    b_attn = jax.random.normal(k2, (1, 3 * C), dtype=jnp.float32) * 0.02
    w_proj = jax.random.normal(k3, (C, C), dtype=jnp.float32) * 0.02
    b_proj = jax.random.normal(k4, (1, C), dtype=jnp.float32) * 0.02

    ref = reference_forward(x, w_attn, b_attn, w_proj, b_proj, n_head)

    # Strict-precision path (f32 matmul operands): verifies kernel semantics tightly.
    out_f32 = symbolic_attention_alibi(x, w_attn, b_attn, w_proj, b_proj, n_head,
                                       compute_dtype=jnp.float32)
    out_f32 = jax.block_until_ready(out_f32)
    np.testing.assert_allclose(np.asarray(out_f32), np.asarray(ref),
                               rtol=1e-4, atol=1e-5)

    # Fast path (bf16 MXU operands, f32 accumulation & softmax statistics).
    out_bf16 = symbolic_attention_alibi(x, w_attn, b_attn, w_proj, b_proj, n_head,
                                        compute_dtype=jnp.bfloat16)
    out_bf16 = jax.block_until_ready(out_bf16)
    np.testing.assert_allclose(np.asarray(out_bf16), np.asarray(ref),
                               rtol=5e-2, atol=5e-3)

    # TODO(synk): attn_dropout / resid_dropout are identity here (p=0 / eval mode).
    print("KERNEL_OK")
</pallas_src>

<mosaic_0001>
module attributes {stable_mosaic.version = 11 : i64} {
  func.func @kernel(%arg0: i32, %arg1: memref<16x32xf32, #tpu.memory_space<vmem>>, %arg2: memref<32x96xf32, #tpu.memory_space<vmem>>, %arg3: memref<1x96xf32, #tpu.memory_space<vmem>>, %arg4: memref<16x32xf32, #tpu.memory_space<vmem>>, %arg5: memref<16x32xf32, #tpu.memory_space<vmem>>, %arg6: memref<16x32xf32, #tpu.memory_space<vmem>>) attributes {dimension_semantics = [#tpu.dimension_semantics<parallel>], iteration_bounds = array<i64: 1>, scalar_prefetch = 0 : i64, scratch_operands = 0 : i64, tpu.core_type = #tpu.core_type<tc>, window_params = [{transform_indices = @transform_0, window_bounds = array<i64: 16, 32>}, {pipeline_mode = #tpu.pipeline_mode<synchronous>, transform_indices = @transform_1, window_bounds = array<i64: 32, 96>}, {pipeline_mode = #tpu.pipeline_mode<synchronous>, transform_indices = @transform_2, window_bounds = array<i64: 1, 96>}, {transform_indices = @transform_3, window_bounds = array<i64: 16, 32>}, {transform_indices = @transform_4, window_bounds = array<i64: 16, 32>}, {transform_indices = @transform_5, window_bounds = array<i64: 16, 32>}]} {
    %c0 = arith.constant 0 : index
    %c0_0 = arith.constant 0 : index
    %0 = vector.load %arg1[%c0, %c0_0] : memref<16x32xf32, #tpu.memory_space<vmem>>, vector<16x32xf32>
    %c0_1 = arith.constant 0 : index
    %c0_2 = arith.constant 0 : index
    %1 = vector.load %arg2[%c0_1, %c0_2] : memref<32x96xf32, #tpu.memory_space<vmem>>, vector<32x96xf32>
    %cst = arith.constant dense<0.000000e+00> : vector<16x96xf32>
    %2 = tpu.matmul %0, %1, %cst {dimension_numbers = #tpu.dot_dimension_numbers<[1], [0], [0], [1], [0, 0, 1, 1], [], []>} : vector<16x32xf32>, vector<32x96xf32>, vector<16x96xf32> -> vector<16x96xf32>
    %c0_3 = arith.constant 0 : index
    %c0_4 = arith.constant 0 : index
    %3 = vector.load %arg3[%c0_3, %c0_4] : memref<1x96xf32, #tpu.memory_space<vmem>>, vector<1x96xf32>
    %4 = vector.broadcast %3 : vector<1x96xf32> to vector<16x96xf32>
    %5 = arith.addf %2, %4 : vector<16x96xf32>
    %6 = vector.extract_strided_slice %5 {offsets = [0, 0], sizes = [16, 32], strides = [1, 1]} : vector<16x96xf32> to vector<16x32xf32>
    %cst_5 = arith.constant 0.353553385 : f32
    %7 = vector.broadcast %cst_5 : f32 to vector<16x32xf32>
    %8 = arith.mulf %6, %7 : vector<16x32xf32>
    %c0_6 = arith.constant 0 : index
    %c0_7 = arith.constant 0 : index
    %9 = vector.load %arg4[%c0_6, %c0_7] : memref<16x32xf32, #tpu.memory_space<vmem>>, vector<16x32xf32>
    tpu.vector_store %arg4[%c0_6, %c0_7], %8 {strides = array<i32>} : memref<16x32xf32, #tpu.memory_space<vmem>>, vector<16x32xf32>,
    %10 = vector.extract_strided_slice %5 {offsets = [0, 32], sizes = [16, 32], strides = [1, 1]} : vector<16x96xf32> to vector<16x32xf32>
    %c0_8 = arith.constant 0 : index
    %c0_9 = arith.constant 0 : index
    %11 = vector.load %arg5[%c0_8, %c0_9] : memref<16x32xf32, #tpu.memory_space<vmem>>, vector<16x32xf32>
    tpu.vector_store %arg5[%c0_8, %c0_9], %10 {strides = array<i32>} : memref<16x32xf32, #tpu.memory_space<vmem>>, vector<16x32xf32>,
    %12 = vector.extract_strided_slice %5 {offsets = [0, 64], sizes = [16, 32], strides = [1, 1]} : vector<16x96xf32> to vector<16x32xf32>
    %c0_10 = arith.constant 0 : index
    %c0_11 = arith.constant 0 : index
    %13 = vector.load %arg6[%c0_10, %c0_11] : memref<16x32xf32, #tpu.memory_space<vmem>>, vector<16x32xf32>
    tpu.vector_store %arg6[%c0_10, %c0_11], %12 {strides = array<i32>} : memref<16x32xf32, #tpu.memory_space<vmem>>, vector<16x32xf32>,
    return
  }
  func.func @transform_0(%arg0: i32) -> (i32, i32) {
    %c0_i32 = arith.constant 0 : i32
    %c0_i32_0 = arith.constant 0 : i32
    return %arg0, %c0_i32 : i32, i32
  }
  func.func @transform_1(%arg0: i32) -> (i32, i32) {
    %c0_i32 = arith.constant 0 : i32
    %c0_i32_0 = arith.constant 0 : i32
    %c0_i32_1 = arith.constant 0 : i32
    return %c0_i32, %c0_i32_0 : i32, i32
  }
  func.func @transform_2(%arg0: i32) -> (i32, i32) {
    %c0_i32 = arith.constant 0 : i32
    %c0_i32_0 = arith.constant 0 : i32
    %c0_i32_1 = arith.constant 0 : i32
    return %c0_i32, %c0_i32_0 : i32, i32
  }
  func.func @transform_3(%arg0: i32) -> (i32, i32) {
    %c0_i32 = arith.constant 0 : i32
    %c0_i32_0 = arith.constant 0 : i32
    return %arg0, %c0_i32 : i32, i32
  }
  func.func @transform_4(%arg0: i32) -> (i32, i32) {
    %c0_i32 = arith.constant 0 : i32
    %c0_i32_0 = arith.constant 0 : i32
    return %arg0, %c0_i32 : i32, i32
  }
  func.func @transform_5(%arg0: i32) -> (i32, i32) {
    %c0_i32 = arith.constant 0 : i32
    %c0_i32_0 = arith.constant 0 : i32
    return %arg0, %c0_i32 : i32, i32
  }
}

</mosaic_0001>

<bundles_post_ra>
// kernel: tpu_custom_call.1
= control target key start
LH: loop header
LB: loop body
LE: loop exit
PB: predicated region body
PF: predicated region fallthrough
CT: control target
= control target key end

     0   :  { %11 = vsyncpa [#allocation3], 0  ;;  %s392_s0 = inlined_call_operand.hbm [shape: f32[16,32], index: 0, kind: input, shape index: {}]   ;;  %s393_s1 = inlined_call_operand.hbm [shape: f32[32,96], index: 1, kind: input, shape index: {}]   ;;  %s394_s2 = inlined_call_operand.vmem [shape: f32[1,96], index: 2, kind: input, shape index: {}]   ;;  %s395_s3 = inlined_call_operand.hbm [shape: f32[16,32], index: 3, kind: output, shape index: {0}]   ;;  %s396_s4 = inlined_call_operand.hbm [shape: f32[16,32], index: 4, kind: output, shape index: {1}]   ;;  %s397_s5 = inlined_call_operand.hbm [shape: f32[16,32], index: 5, kind: output, shape index: {2}]  }
   0x1   :  { %12 = vsyncpa [#allocation6], 0 }
   0x2   :  { %13 = vsyncpa [#allocation4], 0 }
   0x3   :  { %14 = vsyncpa [#allocation9], 0  ;;  %s19_s20 = sshll.u32 %s392_s0, 4  ;;  %s312_s21 = smov [#allocation2]   ;;  %s20_s20 = int_to_ptr.hbm [resolvable:$true] %s19_s20 }
   0x4   :  { %s21_s22 = sshll.u32 %s312_s21, 4  ;;  %s32_s25 = sshll.u32 %s393_s1, 4  ;;  %s22_s22 = int_to_ptr.vmem [resolvable:$true] %s21_s22  ;;  %s33_s25 = int_to_ptr.hbm [resolvable:$true] %s32_s25 }
   0x5   :  { %s313_s26 = smov 128   ;;  %s314_s27 = smov 8  }
   0x6   :  { %27 = dma.hbm_to_vmem [thread:$0]  %s20_s20, 256, %s22_s22, [#allocation3], %s313_s26, %s313_s26, %s314_s27  }
   0x7   :  { %s315_s28 = smov [#allocation5]  }
   0x8   :  { %s34_s29 = sshll.u32 %s315_s28, 4  ;;  %s35_s29 = int_to_ptr.vmem [resolvable:$true] %s34_s29 }
   0x9   :  { %40 = dma.hbm_to_vmem [thread:$0]  %s33_s25, 512, %s35_s29, [#allocation6], %s313_s26, %s313_s26, %s314_s27  }
   0xa   :  { %304 = dma.done.wait [#allocation3], 256  }
   0xb   :  { %305 = vsyncadd [#allocation3], 4294967040 }
   0xc   :  { %306 = dma.done.wait [#allocation6], 512  }
   0xd   :  { %307 = vsyncadd [#allocation6], 4294966784  ;;  %v56_v0 = vld [vmem:[#allocation5 + $0x18] sm:$0xff]  ;;  %v55_v1 = vld [vmem:[#allocation5 + $0x10] sm:$0xff]  ;;  %vm61_vm0 = vcmask 261120   ;;  %s316_s30 = smov [#allocation7]  }
   0xe   :  { %80 = vmatpush.msra.mxu0 %v56_v0  ;;  %170 = vmatpush.msra.mxu1 %v56_v0  ;;  %v54_v2 = vld [vmem:[#allocation5 + $0x8] sm:$0xff]  ;;  %v53_v3 = vld [vmem:[#allocation5] sm:$0xff]  ;;  %v51_v4 = vld [vmem:[#allocation2] sm:$0xff]  ;;  %s117_s6 = sshll.u32 %s316_s30, 4  ;;  %s119_s9 = sshll.u32 %s395_s3, 4  ;;  %s118_s6 = int_to_ptr.vmem [resolvable:$true] %s117_s6  ;;  %s120_s9 = int_to_ptr.hbm [resolvable:$true] %s119_s9 }
   0xf   :  { %v52_v5 = vld [vmem:[#allocation2 + $0x8] sm:$0xff]  ;;  %v183_v6 = vld [vmem:[%s394_s2] ss:$0 sm:$0xff]  ;;  %s317_s10 = smov 64   ;;  %s318_s11 = smov 96  }
  0x10   :  { %81 = vmatpush.msra.mxu0 %v55_v1  ;;  %171 = vmatpush.msra.mxu1 %v55_v1  ;;  %s319_s2 = smov [#allocation8]   ;;  %s132_s14 = sshll.u32 %s396_s4, 4  ;;  %s133_s14 = int_to_ptr.hbm [resolvable:$true] %s132_s14 }
  0x11   :  { %s130_s3 = sshll.u32 %s319_s2, 4  ;;  %s320_s15 = smov [#allocation10]   ;;  %s131_s3 = int_to_ptr.vmem [resolvable:$true] %s130_s3 }
  0x12   :  { %82 = vmatpush.msra.mxu0 %v54_v2  ;;  %172 = vmatpush.msra.mxu1 %v54_v2  ;;  %s143_s16 = sshll.u32 %s320_s15, 4  ;;  %s145_s19 = sshll.u32 %s397_s5, 4  ;;  %s144_s16 = int_to_ptr.vmem [resolvable:$true] %s143_s16  ;;  %s146_s19 = int_to_ptr.hbm [resolvable:$true] %s145_s19 }
  0x14   :  { %83 = vmatpush.msra.mxu0 %v53_v3  ;;  %173 = vmatpush.msra.mxu1 %v53_v3 }
  0x15   :  { %168 = vmatmul.msk.f32.vlgmr.msra.gmra.mxu0 %vm61_vm0, %v51_v4  ;;  %169 = vmatmul.msk.f32.vlgmr.msra.gmra.mxu1 %vm61_vm0, %v52_v5 }
  0x92   :  { %v85_v7 = vpop.f32.mrf.mxu0  ;;  %v88_v8 = vpop.f32.mrf.mxu1 }
  0x93   :  { %v86_v9 = vadd.f32 %v183_v6, %v85_v7  ;;  %v89_v10 = vadd.f32 %v183_v6, %v88_v8 }
  0x95   :  { %v91_v11 = vmul.f32 0.35355338, %v86_v9  ;;  %105 = vrot.lane.b32.xlu1 %v86_v9, %s317_s10  ;;  %97 = vrot.lane.b32.xlu0 %v86_v9, %s318_s11  ;;  %v92_v12 = vmul.f32 0.35355338, %v89_v10 }
  0x97   :  { %93 = vst.msk [vmem:[#allocation7] sm:$0xff] %vm61_vm0, %v91_v11 }
  0x98   :  { %94 = vst.msk [vmem:[#allocation7 + $0x8] sm:$0xff] %vm61_vm0, %v92_v12 }
  0x99   :  { %125 = dma.vmem_to_hbm [thread:$0]  %s118_s6, 256, %s120_s9, [#allocation4], %s313_s26, %s313_s26, %s314_s27  }
  0x9d   :  { %107 = vrot.lane.b32.xlu1 %v89_v10, %s317_s10  ;;  %99 = vrot.lane.b32.xlu0 %v89_v10, %s318_s11 }
 0x107   :  { %v106_v13 = vpop.permute.xlu1 %105  ;;  %v98_v14 = vpop.permute.xlu0 %97 }
 0x108   :  { %111 = vst.msk [vmem:[#allocation10] sm:$0xff] %vm61_vm0, %v106_v13 }
 0x109   :  { %103 = vst.msk [vmem:[#allocation8] sm:$0xff] %vm61_vm0, %v98_v14 }
 0x10f   :  { %v108_v15 = vpop.permute.xlu1 %107  ;;  %v100_v16 = vpop.permute.xlu0 %99 }
 0x110   :  { %112 = vst.msk [vmem:[#allocation10 + $0x8] sm:$0xff] %vm61_vm0, %v108_v15 }
 0x111   :  { %104 = vst.msk [vmem:[#allocation8 + $0x8] sm:$0xff] %vm61_vm0, %v100_v16 }
 0x112   :  { %138 = dma.vmem_to_hbm [thread:$0]  %s131_s3, 256, %s133_s14, [#allocation9], %s313_s26, %s313_s26, %s314_s27  }
 0x113   :  { %151 = dma.vmem_to_hbm [thread:$0]  %s144_s16, 256, %s146_s19, [#allocation9], %s313_s26, %s313_s26, %s314_s27  }
 0x114   :  { %308 = dma.done.wait [#allocation4], 256  }
 0x115   :  { %309 = vsyncadd [#allocation4], 4294967040 }
 0x116   :  { %310 = dma.done.wait [#allocation9], 512  }
 0x117   :  { %311 = vsyncadd [#allocation9], 4294966784 }
 0x118   :  { %164 = vsyncpa [#allocation3], 1 }
 0x119   :  { %165 = vsyncpa [#allocation6], 1 }
 0x11a   :  { %166 = vsyncpa [#allocation4], 1 }
 0x11b   :  { %167 = vsyncpa [#allocation9], 1 }

</bundles_post_ra>
